<compile_context>
chip_gen: v6e
topology: v6e:2x2x1
jax: 0.10.0
libtpu: 0.0.40
codegen_flags: <defaults>
</compile_context>

<pallas_src>
import jax
import jax.numpy as jnp
import numpy as np
from jax.experimental import pallas as pl
from jax.experimental.pallas import tpu as pltpu

_LANE = 128
_SUBLANE = 8
_NUM_CORES = 2                  # leading "parallel" grid axis: sharded across the
                                # two TCs on v7x, runs sequentially (neutral) on v5e/v6e.
_MAX_TILE_ROWS = 2048           # (2,3,2048,128) f32 block = 6 MiB; x2 pipeline buffers
                                # = 12 MiB, under the 32 MiB scoped VMEM we request.
_VMEM_LIMIT_BYTES = 32 * 1024 * 1024
_PALLAS_MIN_POINTS = 1024       # below this the Pallas launch overhead dominates.


def _cdiv(a, b):
    return -(-a // b)


def _round_up(a, m):
    return _cdiv(a, m) * m


# ----------------------------- Pallas kernel ------------------------------ #
def _sq_err_partial_kernel(pc_ref, p_ref, acc_ref):
    """One streaming step of the squared-error reduction.

    grid = (_NUM_CORES, tiles_per_core); axis 0 "parallel" (v7x dual-TC),
    axis 1 "arbitrary" (per-core running reduction).

    pc_ref  : (2, 3, TR, 128) VMEM; [0]=desired cloud, [1]=cloud to transform.
    p_ref   : (12,) SMEM; [R'_00..R'_22 row-major, t0, t1, t2], with
              R' = diag(s, s, 1) @ R (xy-scale folded into the rotation).
    acc_ref : (1, 8, 128) VMEM output block — this core's partial accumulator,
              resident across the "arbitrary" axis (same block index for all i).
    """
    @pl.when(pl.program_id(1) == 0)
    def _():
        acc_ref[...] = jnp.zeros_like(acc_ref)

    x = pc_ref[1, 0]            # (TR, 128) raw (unscaled) coordinates
    y = pc_ref[1, 1]
    z = pc_ref[1, 2]

    # Row-vector convention: out_j = x*R'[0,j] + y*R'[1,j] + z*R'[2,j] + T_j.
    dx = pc_ref[0, 0] - (x * p_ref[0] + y * p_ref[3] + z * p_ref[6] + p_ref[9])
    dy = pc_ref[0, 1] - (x * p_ref[1] + y * p_ref[4] + z * p_ref[7] + p_ref[10])
    dz = pc_ref[0, 2] - (x * p_ref[2] + y * p_ref[5] + z * p_ref[8] + p_ref[11])

    err = dx * dx + dy * dy + dz * dz                               # (TR, 128)
    # Fold sublane groups (cheap VPU vreg adds) into the (8,128) accumulator;
    # the full lane/sublane scalar reduce is deferred to the wrapper.
    part = jnp.sum(err.reshape(err.shape[0] // _SUBLANE, _SUBLANE, _LANE), axis=0)
    acc_ref[...] += part[None, :, :]


# ------------------------ packing (hoistable/cacheable) -------------------- #
def pack_point_clouds(point_cloud_with_desired_pose, point_cloud_2b_transformed,
                      max_tile_rows=_MAX_TILE_ROWS):
    """Repack (B, N, 3) clouds into one lane-dense (2, 3, rows, 128) f32 slab.

    Parameter independent: call ONCE and reuse across optimizer iterations
    (only R / T / s change between steps).  Padded points are zero in BOTH
    clouds; their exact contribution (pad * |T|^2) is subtracted in the wrapper,
    so the slab never needs re-packing when the pose parameters change.
    """
    pcd = point_cloud_with_desired_pose.astype(jnp.float32)
    pc2b = point_cloud_2b_transformed.astype(jnp.float32)
    B, N, D = pcd.shape
    assert D == 3 and N >= 5
    BN = B * N

    rows_needed = _round_up(_cdiv(BN, _LANE), _SUBLANE)
    total_tiles = _round_up(_cdiv(rows_needed, max_tile_rows), _NUM_CORES)
    tile_rows = _round_up(_cdiv(rows_needed, total_tiles), _SUBLANE)
    rows = total_tiles * tile_rows
    pad = rows * _LANE - BN

    pcd_t = pcd.reshape(BN, 3).T                       # (3, BN)
    pc2b_t = pc2b.reshape(BN, 3).T
    if pad:
        zpad = jnp.zeros((3, pad), jnp.float32)
        pcd_t = jnp.concatenate([pcd_t, zpad], axis=1)
        pc2b_t = jnp.concatenate([pc2b_t, zpad], axis=1)
    slab = jnp.stack([pcd_t.reshape(3, rows, _LANE),
                      pc2b_t.reshape(3, rows, _LANE)])  # (2, 3, rows, 128)

    meta = {
        "BN": BN,
        "pad": pad,
        "tile_rows": tile_rows,
        "tiles_per_core": total_tiles // _NUM_CORES,
    }
    small = {                                           # tiny slices for wrapper fixes
        "pcd4": pcd[:, 4, :],       # index-4 down-weight correction
        "pc2b4": pc2b[:, 4, :],
        "pcd_tri": pcd[0, 0:3, :],  # (0.0-weighted) normal term
        "pc2b_tri": pc2b[0, 0:3, :],
    }
    return slab, meta, small


def _pallas_sq_err_sum(slab, meta, params):
    tile_rows = meta["tile_rows"]
    tiles_per_core = meta["tiles_per_core"]
    n_pts = _NUM_CORES * tiles_per_core * tile_rows * _LANE

    partials = pl.pallas_call(
        _sq_err_partial_kernel,
        out_shape=jax.ShapeDtypeStruct((_NUM_CORES, _SUBLANE, _LANE), jnp.float32),
        grid=(_NUM_CORES, tiles_per_core),
        in_specs=[
            pl.BlockSpec((2, 3, tile_rows, _LANE),
                         lambda c, i: (0, 0, c * tiles_per_core + i, 0)),
            pl.BlockSpec(memory_space=pltpu.MemorySpace.SMEM),
        ],
        out_specs=pl.BlockSpec((1, _SUBLANE, _LANE), lambda c, i: (c, 0, 0)),
        compiler_params=pltpu.CompilerParams(
            dimension_semantics=("parallel", "arbitrary"),
            vmem_limit_bytes=_VMEM_LIMIT_BYTES,
        ),
        cost_estimate=pl.CostEstimate(
            flops=30 * n_pts,
            transcendentals=0,
            bytes_accessed=2 * 3 * n_pts * 4
                           + _NUM_CORES * _SUBLANE * _LANE * 4 + 12 * 4,
        ),
    )(slab, params)
    return jnp.sum(partials)


# ------------------------------- JAX glue ---------------------------------- #
def rodrigues_rotation_matrix(rvec):
    """Axis-angle (1,3) -> rotation matrix (3,3) (Rodrigues formula)."""
    r = rvec.reshape(3).astype(jnp.float32)
    theta = jnp.sqrt(jnp.sum(r * r))
    safe_theta = jnp.where(theta > 1e-12, theta, 1.0)
    k = r / safe_theta
    K = jnp.array([[0.0, -k[2], k[1]],
                   [k[2], 0.0, -k[0]],
                   [-k[1], k[0], 0.0]], dtype=jnp.float32)
    R = (jnp.eye(3, dtype=jnp.float32)
         + jnp.sin(theta) * K
         + (1.0 - jnp.cos(theta)) * (K @ K))
    return jnp.where(theta > 1e-12, R, jnp.eye(3, dtype=jnp.float32))


def _triangle_normal(p1, p2, p3):
    # get_normal_from_spanned_triangle_torch: cross(p3 - p1, p2 - p1)
    return jnp.cross(p3 - p1, p2 - p1)


def _pose_terms(r_param_rotation, t_param_translation, scale_xy_plane_param):
    Rm = rodrigues_rotation_matrix(r_param_rotation)                 # (3, 3)
    Tv = jnp.reshape(t_param_translation, (3,)).astype(jnp.float32)
    s = jnp.reshape(scale_xy_plane_param, ()).astype(jnp.float32)
    scale_vec = jnp.stack([s, s, jnp.float32(1.0)])
    Rs = Rm * scale_vec[:, None]                                      # diag(s,s,1) @ R
    return Rm, Rs, Tv


def _normal_loss(pcd_tri, pt_tri):
    nd = _triangle_normal(pcd_tri[0], pcd_tri[1], pcd_tri[2])
    nt = _triangle_normal(pt_tri[0], pt_tri[1], pt_tri[2])
    eps = 1e-8
    denom = jnp.maximum(jnp.linalg.norm(nd) * jnp.linalg.norm(nt), eps * eps)
    return 1.0 - jnp.dot(nd, nt) / denom


def pc_alignment_forward_packed(slab, meta, small,
                                r_param_rotation, t_param_translation,
                                scale_xy_plane_param, euclidean_weight=1.0):
    """Forward using a cached packed slab (repack hoisted out of the step loop)."""
    _, Rs, Tv = _pose_terms(r_param_rotation, t_param_translation,
                            scale_xy_plane_param)
    params = jnp.concatenate([Rs.reshape(9), Tv]).astype(jnp.float32)   # (12,)

    total = _pallas_sq_err_sum(slab, meta, params)
    # 1) zero-padded points (in both clouds) each contributed exactly |T|^2.
    total = total - jnp.float32(meta["pad"]) * jnp.sum(Tv * Tv)
    # 2) point index 4 must be weighted 0.01; the kernel summed it at 1.0.
    pt4 = small["pc2b4"] @ Rs + Tv
    total = total - 0.99 * jnp.sum((small["pcd4"] - pt4) ** 2)
    mean_sq = total / jnp.float32(meta["BN"] * 3)

    # Normal / cosine-similarity term (weighted 0.0 in the reference forward).
    pt_tri = small["pc2b_tri"] @ Rs + Tv
    loss_normal = _normal_loss(small["pcd_tri"], pt_tri)

    loss = mean_sq * euclidean_weight + 0.0 * loss_normal
    return jnp.reshape(loss, (1,))
    # TODO(synk): plotting branch (plot_bool=True, matplotlib) and python-side
    # losses-dict bookkeeping have no kernel equivalent.


def pc_alignment_forward(point_cloud_with_desired_pose,
                         point_cloud_2b_transformed,
                         r_param_rotation,
                         t_param_translation,
                         scale_xy_plane_param,
                         euclidean_weight=1.0,
                         use_pallas=None):
    pcd = point_cloud_with_desired_pose.astype(jnp.float32)
    pc2b = point_cloud_2b_transformed.astype(jnp.float32)
    B, N, D = pcd.shape
    assert D == 3 and N >= 5
    BN = B * N

    if use_pallas is None:
        use_pallas = BN >= _PALLAS_MIN_POINTS   # tiny clouds: launch-overhead bound

    if use_pallas:
        # NOTE: in an optimizer loop, call pack_point_clouds() ONCE outside the
        # loop and use pc_alignment_forward_packed directly — only R/T/s change.
        slab, meta, small = pack_point_clouds(pcd, pc2b)
        return pc_alignment_forward_packed(slab, meta, small,
                                           r_param_rotation, t_param_translation,
                                           scale_xy_plane_param, euclidean_weight)

    # Plain-XLA fallback for small clouds.
    _, Rs, Tv = _pose_terms(r_param_rotation, t_param_translation,
                            scale_xy_plane_param)
    pt = pc2b @ Rs + Tv
    lv = (pcd - pt) ** 2
    lv = lv.at[:, 4, :].multiply(0.01)
    mean_sq = lv.mean()
    loss_normal = _normal_loss(pcd[0, 0:3], pt[0, 0:3])
    loss = mean_sq * euclidean_weight + 0.0 * loss_normal
    return jnp.reshape(loss, (1,))


# --------------------------- pure-JAX reference ---------------------------- #
def _reference_forward(pcd, pc2b, r, t, s, w=1.0):
    pcd = pcd.astype(jnp.float32)
    pc2b = pc2b.astype(jnp.float32)
    R = rodrigues_rotation_matrix(r)
    scale_m = jnp.diag(jnp.array([s, s, 1.0], dtype=jnp.float32))
    pt = (pc2b @ scale_m) @ R + jnp.reshape(t, (1, 1, 3))
    lv = (pcd - pt) ** 2
    lv = lv.at[:, 4, :].multiply(0.01)
    nd = _triangle_normal(pcd[0, 0], pcd[0, 1], pcd[0, 2])
    nt = _triangle_normal(pt[0, 0], pt[0, 1], pt[0, 2])
    eps = 1e-8
    cos = jnp.dot(nd, nt) / jnp.maximum(
        jnp.linalg.norm(nd) * jnp.linalg.norm(nt), eps * eps)
    return jnp.reshape(lv.mean() * w + 0.0 * (1.0 - cos), (1,))


# --------------------------------- main ------------------------------------ #
if __name__ == "__main__":
    key = jax.random.PRNGKey(0)

    # Small cases go through the XLA gate; the larger ones exercise the Pallas
    # kernel (including lane/row padding and the dual-core partial sums).
    for (B, N) in [(2, 8), (3, 37), (3, 350), (4, 640)]:
        k1, k2, k3, k4, key = jax.random.split(key, 5)
        pcd = jax.random.normal(k1, (B, N, 3), jnp.float32)
        pc2b = jax.random.normal(k2, (B, N, 3), jnp.float32)
        r = 0.1 * jax.random.normal(k3, (1, 3), jnp.float32)
        t = 0.05 * jax.random.normal(k4, (1, 3), jnp.float32)
        s = jnp.float32(1.1)

        loss = jax.block_until_ready(
            pc_alignment_forward(pcd, pc2b, r, t, s, euclidean_weight=1.0))
        ref = _reference_forward(pcd, pc2b, r, t, s, 1.0)
        np.testing.assert_allclose(np.asarray(loss), np.asarray(ref),
                                   rtol=1e-4, atol=1e-5)

    # Demonstrate the hoisted/cached packing: pack once, evaluate the Pallas
    # forward at two different parameter sets (as an optimizer loop would).
    B, N = 4, 640
    k1, k2, key = jax.random.split(key, 3)
    pcd = jax.random.normal(k1, (B, N, 3), jnp.float32)
    pc2b = jax.random.normal(k2, (B, N, 3), jnp.float32)
    slab, meta, small = pack_point_clouds(pcd, pc2b)
    slab = jax.block_until_ready(slab)
    for step in range(2):
        k3, k4, key = jax.random.split(key, 3)
        r = 0.1 * jax.random.normal(k3, (1, 3), jnp.float32)
        t = 0.05 * jax.random.normal(k4, (1, 3), jnp.float32)
        s = jnp.float32(1.0 + 0.05 * step)
        loss = jax.block_until_ready(
            pc_alignment_forward_packed(slab, meta, small, r, t, s, 1.0))
        ref = _reference_forward(pcd, pc2b, r, t, s, 1.0)
        np.testing.assert_allclose(np.asarray(loss), np.asarray(ref),
                                   rtol=1e-4, atol=1e-5)

    print("KERNEL_OK")
</pallas_src>

<mosaic_0001>
module attributes {stable_mosaic.version = 11 : i64} {
  func.func @_sq_err_partial_kernel(%arg0: i32, %arg1: i32, %arg2: memref<2x3x8x128xf32, #tpu.memory_space<vmem>>, %arg3: memref<12xf32, #tpu.memory_space<smem>>, %arg4: memref<1x8x128xf32, #tpu.memory_space<vmem>>) attributes {dimension_semantics = [#tpu.dimension_semantics<parallel>, #tpu.dimension_semantics<arbitrary>], iteration_bounds = array<i64: 2, 1>, scalar_prefetch = 0 : i64, scratch_operands = 0 : i64, tpu.core_type = #tpu.core_type<tc>, window_params = [{transform_indices = @transform_0, window_bounds = array<i64: 2, 3, 8, 128>}, {transform_indices = @transform_1, window_bounds = array<i64: 12>}, {transform_indices = @transform_2, window_bounds = array<i64: 1, 8, 128>}]} {
    %c0_i32 = arith.constant 0 : i32
    %0 = arith.cmpi eq, %arg1, %c0_i32 : i32
    %1 = arith.extui %0 : i1 to i32
    %c0_i32_0 = arith.constant 0 : i32
    %2 = arith.cmpi ne, %1, %c0_i32_0 : i32
    scf.if %2 {
      %cst_31 = arith.constant 0.000000e+00 : f32
      %71 = vector.broadcast %cst_31 : f32 to vector<1x8x128xf32>
      %c0_32 = arith.constant 0 : index
      %c0_33 = arith.constant 0 : index
      %c0_34 = arith.constant 0 : index
      %72 = vector.load %arg4[%c0_32, %c0_33, %c0_34] : memref<1x8x128xf32, #tpu.memory_space<vmem>>, vector<1x8x128xf32>
      tpu.vector_store %arg4[%c0_32, %c0_33, %c0_34], %71 {strides = array<i32>} : memref<1x8x128xf32, #tpu.memory_space<vmem>>, vector<1x8x128xf32>,
    } else {
    }
    %c1 = arith.constant 1 : index
    %c0 = arith.constant 0 : index
    %c0_1 = arith.constant 0 : index
    %c0_2 = arith.constant 0 : index
    %3 = vector.load %arg2[%c1, %c0, %c0_1, %c0_2] : memref<2x3x8x128xf32, #tpu.memory_space<vmem>>, vector<1x1x8x128xf32>
    %4 = vector.shape_cast %3 : vector<1x1x8x128xf32> to vector<8x128xf32>
    %c1_3 = arith.constant 1 : index
    %c1_4 = arith.constant 1 : index
    %c0_5 = arith.constant 0 : index
    %c0_6 = arith.constant 0 : index
    %5 = vector.load %arg2[%c1_3, %c1_4, %c0_5, %c0_6] : memref<2x3x8x128xf32, #tpu.memory_space<vmem>>, vector<1x1x8x128xf32>
    %6 = vector.shape_cast %5 : vector<1x1x8x128xf32> to vector<8x128xf32>
    %c1_7 = arith.constant 1 : index
    %c2 = arith.constant 2 : index
    %c0_8 = arith.constant 0 : index
    %c0_9 = arith.constant 0 : index
    %7 = vector.load %arg2[%c1_7, %c2, %c0_8, %c0_9] : memref<2x3x8x128xf32, #tpu.memory_space<vmem>>, vector<1x1x8x128xf32>
    %8 = vector.shape_cast %7 : vector<1x1x8x128xf32> to vector<8x128xf32>
    %c0_10 = arith.constant 0 : index
    %c0_11 = arith.constant 0 : index
    %c0_12 = arith.constant 0 : index
    %c0_13 = arith.constant 0 : index
    %9 = vector.load %arg2[%c0_10, %c0_11, %c0_12, %c0_13] : memref<2x3x8x128xf32, #tpu.memory_space<vmem>>, vector<1x1x8x128xf32>
    %10 = vector.shape_cast %9 : vector<1x1x8x128xf32> to vector<8x128xf32>
    %c0_14 = arith.constant 0 : index
    %11 = memref.load %arg3[%c0_14] : memref<12xf32, #tpu.memory_space<smem>>
    %12 = vector.broadcast %11 : f32 to vector<8x128xf32>
    %13 = arith.mulf %4, %12 : vector<8x128xf32>
    %c3 = arith.constant 3 : index
    %14 = memref.load %arg3[%c3] : memref<12xf32, #tpu.memory_space<smem>>
    %15 = vector.broadcast %14 : f32 to vector<8x128xf32>
    %16 = arith.mulf %6, %15 : vector<8x128xf32>
    %17 = arith.addf %13, %16 : vector<8x128xf32>
    %c6 = arith.constant 6 : index
    %18 = memref.load %arg3[%c6] : memref<12xf32, #tpu.memory_space<smem>>
    %19 = vector.broadcast %18 : f32 to vector<8x128xf32>
    %20 = arith.mulf %8, %19 : vector<8x128xf32>
    %21 = arith.addf %17, %20 : vector<8x128xf32>
    %c9 = arith.constant 9 : index
    %22 = memref.load %arg3[%c9] : memref<12xf32, #tpu.memory_space<smem>>
    %23 = vector.broadcast %22 : f32 to vector<8x128xf32>
    %24 = arith.addf %21, %23 : vector<8x128xf32>
    %25 = arith.subf %10, %24 : vector<8x128xf32>
    %c0_15 = arith.constant 0 : index
    %c1_16 = arith.constant 1 : index
    %c0_17 = arith.constant 0 : index
    %c0_18 = arith.constant 0 : index
    %26 = vector.load %arg2[%c0_15, %c1_16, %c0_17, %c0_18] : memref<2x3x8x128xf32, #tpu.memory_space<vmem>>, vector<1x1x8x128xf32>
    %27 = vector.shape_cast %26 : vector<1x1x8x128xf32> to vector<8x128xf32>
    %c1_19 = arith.constant 1 : index
    %28 = memref.load %arg3[%c1_19] : memref<12xf32, #tpu.memory_space<smem>>
    %29 = vector.broadcast %28 : f32 to vector<8x128xf32>
    %30 = arith.mulf %4, %29 : vector<8x128xf32>
    %c4 = arith.constant 4 : index
    %31 = memref.load %arg3[%c4] : memref<12xf32, #tpu.memory_space<smem>>
    %32 = vector.broadcast %31 : f32 to vector<8x128xf32>
    %33 = arith.mulf %6, %32 : vector<8x128xf32>
    %34 = arith.addf %30, %33 : vector<8x128xf32>
    %c7 = arith.constant 7 : index
    %35 = memref.load %arg3[%c7] : memref<12xf32, #tpu.memory_space<smem>>
    %36 = vector.broadcast %35 : f32 to vector<8x128xf32>
    %37 = arith.mulf %8, %36 : vector<8x128xf32>
    %38 = arith.addf %34, %37 : vector<8x128xf32>
    %c10 = arith.constant 10 : index
    %39 = memref.load %arg3[%c10] : memref<12xf32, #tpu.memory_space<smem>>
    %40 = vector.broadcast %39 : f32 to vector<8x128xf32>
    %41 = arith.addf %38, %40 : vector<8x128xf32>
    %42 = arith.subf %27, %41 : vector<8x128xf32>
    %c0_20 = arith.constant 0 : index
    %c2_21 = arith.constant 2 : index
    %c0_22 = arith.constant 0 : index
    %c0_23 = arith.constant 0 : index
    %43 = vector.load %arg2[%c0_20, %c2_21, %c0_22, %c0_23] : memref<2x3x8x128xf32, #tpu.memory_space<vmem>>, vector<1x1x8x128xf32>
    %44 = vector.shape_cast %43 : vector<1x1x8x128xf32> to vector<8x128xf32>
    %c2_24 = arith.constant 2 : index
    %45 = memref.load %arg3[%c2_24] : memref<12xf32, #tpu.memory_space<smem>>
    %46 = vector.broadcast %45 : f32 to vector<8x128xf32>
    %47 = arith.mulf %4, %46 : vector<8x128xf32>
    %c5 = arith.constant 5 : index
    %48 = memref.load %arg3[%c5] : memref<12xf32, #tpu.memory_space<smem>>
    %49 = vector.broadcast %48 : f32 to vector<8x128xf32>
    %50 = arith.mulf %6, %49 : vector<8x128xf32>
    %51 = arith.addf %47, %50 : vector<8x128xf32>
    %c8 = arith.constant 8 : index
    %52 = memref.load %arg3[%c8] : memref<12xf32, #tpu.memory_space<smem>>
    %53 = vector.broadcast %52 : f32 to vector<8x128xf32>
    %54 = arith.mulf %8, %53 : vector<8x128xf32>
    %55 = arith.addf %51, %54 : vector<8x128xf32>
    %c11 = arith.constant 11 : index
    %56 = memref.load %arg3[%c11] : memref<12xf32, #tpu.memory_space<smem>>
    %57 = vector.broadcast %56 : f32 to vector<8x128xf32>
    %58 = arith.addf %55, %57 : vector<8x128xf32>
    %59 = arith.subf %44, %58 : vector<8x128xf32>
    %60 = arith.mulf %25, %25 : vector<8x128xf32>
    %61 = arith.mulf %42, %42 : vector<8x128xf32>
    %62 = arith.addf %60, %61 : vector<8x128xf32>
    %63 = arith.mulf %59, %59 : vector<8x128xf32>
    %64 = arith.addf %62, %63 : vector<8x128xf32>
    %65 = vector.shape_cast %64 : vector<8x128xf32> to vector<1x8x128xf32>
    %cst = arith.constant dense<0.000000e+00> : vector<8x128xf32>
    %66 = vector.multi_reduction <add>, %65, %cst [0] : vector<1x8x128xf32> to vector<8x128xf32>
    %c0_25 = arith.constant 0 : index
    %c0_26 = arith.constant 0 : index
    %c0_27 = arith.constant 0 : index
    %67 = vector.load %arg4[%c0_25, %c0_26, %c0_27] : memref<1x8x128xf32, #tpu.memory_space<vmem>>, vector<1x8x128xf32>
    %68 = vector.shape_cast %66 : vector<8x128xf32> to vector<1x8x128xf32>
    %69 = arith.addf %67, %68 : vector<1x8x128xf32>
    %c0_28 = arith.constant 0 : index
    %c0_29 = arith.constant 0 : index
    %c0_30 = arith.constant 0 : index
    %70 = vector.load %arg4[%c0_28, %c0_29, %c0_30] : memref<1x8x128xf32, #tpu.memory_space<vmem>>, vector<1x8x128xf32>
    tpu.vector_store %arg4[%c0_28, %c0_29, %c0_30], %69 {strides = array<i32>} : memref<1x8x128xf32, #tpu.memory_space<vmem>>, vector<1x8x128xf32>,
    return
  }
  func.func @transform_0(%arg0: i32, %arg1: i32) -> (i32, i32, i32, i32) {
    %c1_i32 = arith.constant 1 : i32
    %0 = arith.muli %arg0, %c1_i32 : i32
    %1 = arith.addi %0, %arg1 : i32
    %c0_i32 = arith.constant 0 : i32
    %c0_i32_0 = arith.constant 0 : i32
    %c0_i32_1 = arith.constant 0 : i32
    %c0_i32_2 = arith.constant 0 : i32
    return %c0_i32, %c0_i32_0, %1, %c0_i32_1 : i32, i32, i32, i32
  }
  func.func @transform_1(%arg0: i32, %arg1: i32) -> i32 {
    %c0_i32 = arith.constant 0 : i32
    %c0_i32_0 = arith.constant 0 : i32
    return %c0_i32 : i32
  }
  func.func @transform_2(%arg0: i32, %arg1: i32) -> (i32, i32, i32) {
    %c0_i32 = arith.constant 0 : i32
    %c0_i32_0 = arith.constant 0 : i32
    %c0_i32_1 = arith.constant 0 : i32
    return %arg0, %c0_i32, %c0_i32_0 : i32, i32, i32
  }
}

</mosaic_0001>

<bundles_post_ra>
// kernel: tpu_custom_call.1
= control target key start
LH: loop header
LB: loop body
LE: loop exit
PB: predicated region body
PF: predicated region fallthrough
CT: control target
= control target key end

     0   :  { %7 = vsyncpa [#allocation3], 0  ;;  %s802_s0 = inlined_call_operand.hbm [shape: f32[2,3,16,128], index: 0, kind: input, shape index: {}]   ;;  %s803_s1 = inlined_call_operand.vmem [shape: f32[12], index: 1, kind: input, shape index: {}]   ;;  %s804_s2 = inlined_call_operand.hbm [shape: f32[2,8,128], index: 2, kind: output, shape index: {}]  }
   0x1   :  { %9 = vsyncpa [#allocation3 + $0x1], 0 }
   0x2   :  { %10 = vsyncpa [#allocation5], 0 }
   0x3   :  { %11 = vsyncpa [#allocation4], 0 }
   0x4   :  { %13 = vsyncpa [#allocation4 + $0x1], 0  ;;  %s624_s9 = smov 0   ;;  %s626_s10 = smov 0  }
   0x5   :  { %s628_s11 = smov 0   ;;  %s630_s12 = smov 0  }
   0x6   :  { %s632_s13 = smov 0   ;;  %s634_s14 = smov 0  }
   0x7 LB: > { %s366_s15 = sadd.s32 4294967295, %s601_s14   ;;  %s367_s16 = sadd.s32 4294967294, %s601_s14   ;;  %s601_s14 = sphi %s634_s14, %s19_s14   ;;  %s597_s13 = sphi %s632_s13, %s822_s13   ;;  %s593_s12 = sphi %s630_s12, %s821_s12   ;;  %s589_s11 = sphi %s628_s11, %s820_s11   ;;  %s585_s10 = sphi %s626_s10, %s819_s10   ;;  %s581_s9 = sphi %s624_s9, %s818_s9  }
   0x8   : > { %s40_s17 = sadd.s32 1, %s589_s11  ;;  %p47_p0 = scmp.ne.s32.totalorder %s589_s11, %s585_s10 }
   0x9   : > { %p48_p1 = scmp.eq.s32.totalorder %s601_s14, 0  ;;  %p53_p2 = scmp.ne.s32.totalorder %s585_s10, %s581_s9 }
   0xa   : > { %p662_p3 = scmp.eq.s32.totalorder %s366_s15, 0  ;;  %p98_p4 = scmp.eq.s32.totalorder %s366_s15, 1 }
   0xb   : > { %p666_p5 = por %p48_p1, %p47_p0  ;;  %p104_p6 = scmp.eq.s32.totalorder %s367_s16, 1 }
   0xc   : > { %p672_p7 = por %p662_p3, %p53_p2  ;;  %p676_p8 = por %p98_p4, %p47_p0 }
   0xd   : > { %p680_p9 = por %p104_p6, %p53_p2  ;;  %p368_p10 = scmp.ge.s32.totalorder %s601_s14, 1 }
   0xe   : > { %s809_s21 = scalar_select %p676_p8, 1, 0 }
   0xf   : > { %s810_s22 = scalar_select %p680_p9, 1, 0 }
  0x10   : > { %p111_p11 = scmp.lt.s32.totalorder %s601_s14, 3  ;;  %s124_s25 = sshll.u32 %s803_s1, 4  ;;  %s125_s25 = int_to_ptr.vmem [resolvable:$true] %s124_s25 }
  0x11   : > { %p418_p0 = scmp.lt.s32.totalorder %s601_s14, 2  ;;  %s31_s29 = sadd.s32 1, %s597_s13 }
  0x12   : > { %p689_p12 = pnand %p368_p10, %p111_p11  ;;  %p710_p6 = scmp.ge.s32.totalorder %s31_s29, 2 }
  0x13   : > { %p699_p2 = pnand %p418_p0, %p666_p5  ;;  %s135_s3 = sand.u32 1, %s589_s11  }
  0x14   : > { %p405_p1 = pneg %p689_p12  ;;  %s474_s4 = scalar_lea.vmem %s125_s25, 16 }
  0x15   : > { %p475_p10 = scmp.ne.s32.totalorder %s125_s25, %s474_s4  ;;  %p482_p13 = scmp.lt.s32.totalorder %s125_s25, %s125_s25 }
  0x16   : > { %p705_p4 = pnand %p405_p1, %p662_p3  ;;  %p483_p9 = scmp.lt.s32.totalorder %s474_s4, %s474_s4 }
  0x18   : > { %p476_p11 = pneg %p705_p4  ;;  %p484_p8 = por %p483_p9, %p482_p13 }
  0x1a   : > { %p477_p5 = pnand %p476_p11, %p475_p10 }
  0x1c   : > { %p478_p0 = pneg %p477_p5 }
  0x1e   : > { %p485_p1 = pnand %p484_p8, %p478_p0 }
  0x20   : > { %488 = shalt.err (!%p485_p1)
}
  0x21   : > { %s603_s5 = smov [#allocation6]   ;;  %s824_s29 = smov (%p710_p6, %s31_s29), 0 }
  0x22   : > { %408 = dma.vmem_to_smem (!%p705_p4), %s125_s25, 16, %s603_s5, [#allocation5]  }
  0x23   : > { %s395_s6 = smul.u32 48, %s135_s3  ;;  %s37_s7 = ssub.s32 %s597_s13, %s824_s29 }
  0x24   : > { %s371_s8 = sshll.u32 %s597_s13, 7  ;;  %p38_p9 = scmp.eq.s32.totalorder %s37_s7, 0 }
  0x25   : > { %s145_s19 = scalar_lea.hbm %s802_s0, %s371_s8  ;;  %s139_s23 = scalar_lea.vmem [#allocation2], %s395_s6 }
  0x26   : > { %s146_s24 = sshll.u32 %s139_s23, 4  ;;  %s136_s4 = scalar_lea.sflag [#allocation3], %s135_s3  ;;  %s147_s24 = int_to_ptr.vmem [resolvable:$true] %s146_s24 }
  0x27   : > { %s732_s28 = scalar_select %p38_p9, %s589_s11, %s40_s17  }
  0x28   : > { %p491_p8 = pneg %p699_p2  ;;  %s502_s25 = scalar_lea.vmem %s147_s24, 768 }
  0x29   : > { %p503_p13 = scmp.ne.s32.totalorder %s147_s24, %s502_s25  ;;  %s604_s30 = smov [#allocation2]  }
  0x2a   : > { %s507_s5 = sshll.u32 %s604_s30, 4  ;;  %s508_s5 = int_to_ptr.vmem [resolvable:$false] %s507_s5 }
  0x2b   : > { %p505_p4 = pnand %p503_p13, %p491_p8  ;;  %s509_s7 = scalar_lea.vmem %s508_s5, 1536 }
  0x2c   : > { %p510_p10 = scmp.lt.s32.totalorder %s147_s24, %s508_s5  ;;  %p511_p11 = scmp.lt.s32.totalorder %s509_s7, %s502_s25 }
  0x2d   : > { %p506_p6 = pneg %p505_p4 }
  0x2e   : > { %p512_p5 = por %p511_p11, %p510_p10 }
  0x30   : > { %p513_p0 = pnand %p512_p5, %p506_p6 }
  0x32   : > { %516 = shalt.err (!%p513_p0)
}
  0x33   : > { %s605_s6 = smov 256   ;;  %s606_s17 = smov 128  }
  0x34   : > { %s607_s8 = smov 8   ;;  %158 = sbr.rel (%p689_p12) target bundleno = 106 (0x6a), region = 28 }
  0x35   : > { %412 = dma.hbm_to_vmem [thread:$0]  (!%p699_p2), %s145_s19, 768, %s147_s24, %s136_s4, %s605_s6, %s606_s17, %s607_s8  }
  0x36   : > { %s741_s3 = sand.u32 (!%p689_p12), 1, %s585_s10  }
  0x37   : > { %s396_s15 = smul.u32 (!%p689_p12), 48, %s741_s3  ;;  %s161_s16 = scalar_lea.sflag (!%p689_p12), [#allocation3], %s741_s3 }
  0x39   : > { %s745_s23 = scalar_lea.vmem [#allocation2], %s396_s15 }
  0x3a   : > { %568 = dma.done.wait (%p672_p7), %s161_s16, 768  }
  0x3b   : > { %570 = vsyncadd (%p672_p7), %s161_s16, 4294966528 }
  0x3c   : > { %572 = dma.done.wait (%p662_p3), [#allocation5], 16  }
  0x3d   : > { %574 = vsyncadd (%p662_p3), [#allocation5], 4294967280 }
  0x3e   : > { %173 = sfence }
  0x3f   : > { %s203_s26 = sld [smem:[#allocation6]]  ;;  %v375_v0 = vld [vmem:[%s745_s23 + $0x18] sm:$0xff]  ;;  %v376_v1 = vld [vmem:[%s745_s23 + $0x20] sm:$0xff]  ;;  %v377_v2 = vld [vmem:[%s745_s23 + $0x28] sm:$0xff]  ;;  %s374_s17 = sshll.u32 %s741_s3, 3 }
  0x40   : > { %s378_s27 = sld [smem:[#allocation6 + $0x3]]  ;;  %v202_v17 = vld [vmem:[%s745_s23] sm:$0xff]  ;;  %v381_v29 = vld [vmem:[%s745_s23 + $0x8] sm:$0xff]  ;;  %v386_v37 = vld [vmem:[%s745_s23 + $0x10] sm:$0xff]  ;;  %s392_s8 = sshll.u32 %s593_s12, 7 }
  0x41   : > { %s379_s19 = sld [smem:[#allocation6 + $0x6]]  ;;  %s189_s15 = scalar_lea.vmem [#allocation7], %s374_s17 }
  0x42   : > { %s380_s24 = sld [smem:[#allocation6 + $0x9]]  ;;  %s275_s16 = sshll.u32 %s189_s15, 4  ;;  %s276_s16 = int_to_ptr.vmem [resolvable:$true] %s275_s16 }
  0x43   : > { %s382_s4 = sld [smem:[#allocation6 + $0x1]]  ;;  %p815_p7 = scmp.ne.s32.totalorder %s809_s21, 0 }
  0x44   : > { %s383_s25 = sld [smem:[#allocation6 + $0x4]]  ;;  %s608_s23 = smov [#allocation7]  }
  0x45   : > { %v204_v3 = vstv %s203_s26  ;;  %s384_s20 = sld [smem:[#allocation6 + $0x7]] }
  0x46   : > { %v205_v4 = vmul.f32 %v375_v0, %v204_v3  ;;  %v207_v5 = vstv %s378_s27  ;;  %s385_s30 = sld [smem:[#allocation6 + $0xa]] }
  0x47   : > { %v208_v6 = vmul.f32 %v376_v1, %v207_v5  ;;  %v211_v7 = vstv %s379_s19  ;;  %s387_s18 = sld [smem:[#allocation6 + $0x2]]  ;;  %s273_s19 = scalar_lea.hbm %s804_s2, %s392_s8 }
  0x48   : > { %v212_v8 = vmul.f32 %v377_v2, %v211_v7  ;;  %s388_s5 = sld [smem:[#allocation6 + $0x5]]  ;;  %v215_v11 = vstv %s380_s24  ;;  %s262_s24 = scalar_lea.sflag [#allocation4], %s741_s3 }
  0x49   : > { %v209_v9 = vadd.f32 %v208_v6, %v205_v4  ;;  %v221_v10 = vstv %s382_s4  ;;  %s389_s7 = sld [smem:[#allocation6 + $0x8]]  ;;  %s517_s4 = scalar_lea.vmem %s276_s16, 128 }
  0x4a   : > { %v222_v12 = vmul.f32 %v375_v0, %v221_v10  ;;  %v224_v13 = vstv %s383_s25  ;;  %s390_s6 = sld [smem:[#allocation6 + $0xb]]  ;;  %p518_p3 = scmp.ne.s32.totalorder %s276_s16, %s517_s4 }
  0x4b   : > { %v213_v14 = vadd.f32 %v212_v8, %v209_v9  ;;  %v225_v15 = vmul.f32 %v376_v1, %v224_v13  ;;  %v228_v16 = vstv %s384_s20  ;;  %s521_s25 = sshll.u32 %s608_s23, 4  ;;  %s522_s25 = int_to_ptr.vmem [resolvable:$false] %s521_s25 }
  0x4c   : > { %v229_v18 = vmul.f32 %v377_v2, %v228_v16  ;;  %v232_v22 = vstv %s385_s30  ;;  %p519_p12 = pnand %p518_p3, %p815_p7  ;;  %s523_s20 = scalar_lea.vmem %s522_s25, 256 }
  0x4d   : > { %v216_v19 = vadd.f32 %v215_v11, %v213_v14  ;;  %v226_v20 = vadd.f32 %v225_v15, %v222_v12  ;;  %v238_v21 = vstv %s387_s18  ;;  %p524_p1 = scmp.lt.s32.totalorder %s276_s16, %s522_s25  ;;  %p525_p9 = scmp.lt.s32.totalorder %s523_s20, %s517_s4 }
  0x4e   : > { %v239_v23 = vmul.f32 %v375_v0, %v238_v21  ;;  %v241_v24 = vstv %s388_s5  ;;  %p520_p2 = pneg %p519_p12 }
  0x4f   : > { %v217_v25 = vsub.f32 %v202_v17, %v216_v19  ;;  %v230_v26 = vadd.f32 %v229_v18, %v226_v20  ;;  %v242_v27 = vmul.f32 %v376_v1, %v241_v24  ;;  %v245_v28 = vstv %s389_s7  ;;  %p526_p8 = por %p525_p9, %p524_p1 }
  0x50   : > { %v246_v30 = vmul.f32 %v377_v2, %v245_v28  ;;  %v249_v33 = vstv %s390_s6 }
  0x51   : > { %v233_v31 = vadd.f32 %v232_v22, %v230_v26  ;;  %v243_v32 = vadd.f32 %v242_v27, %v239_v23  ;;  %v252_v36 = vmul.f32 %v217_v25, %v217_v25  ;;  %p527_p13 = pnand %p526_p8, %p520_p2 }
  0x53   : > { %v234_v34 = vsub.f32 %v381_v29, %v233_v31  ;;  %v247_v35 = vadd.f32 %v246_v30, %v243_v32 }
  0x55   : > { %v250_v38 = vadd.f32 %v249_v33, %v247_v35  ;;  %v253_v39 = vmul.f32 %v234_v34, %v234_v34 }
  0x57   : > { %v251_v40 = vsub.f32 %v386_v37, %v250_v38  ;;  %v254_v41 = vadd.f32 %v253_v39, %v252_v36 }
  0x59   : > { %v255_v42 = vmul.f32 %v251_v40, %v251_v40 }
  0x5b   : > { %v256_v43 = vadd.f32 %v255_v42, %v254_v41 }
  0x5d   : > { %260 = vst [vmem:[%s189_s15] sm:$0xff] %v256_v43 }
  0x5e   : > { %530 = shalt.err (!%p527_p13)
}
  0x5f   : > { %s531_s12 = scalar_lea.hbm %s273_s19, 128  ;;  %s535_s18 = scalar_lea.hbm %s804_s2, 256 }
  0x60   : > { %p532_p4 = scmp.ne.s32.totalorder %s273_s19, %s531_s12  ;;  %p536_p11 = scmp.lt.s32.totalorder %s273_s19, %s804_s2 }
  0x61   : > { %p537_p5 = scmp.lt.s32.totalorder %s535_s18, %s531_s12 }
  0x62   : > { %p533_p6 = pnand %p532_p4, %p815_p7 }
  0x63   : > { %p538_p0 = por %p537_p5, %p536_p11 }
  0x64   : > { %p534_p10 = pneg %p533_p6 }
  0x66   : > { %p539_p3 = pnand %p538_p0, %p534_p10 }
  0x68   : > { %542 = shalt.err (!%p539_p3)
}
  0x69   : > { %403 = dma.vmem_to_hbm [thread:$0]  (%p815_p7), %s276_s16, 128, %s273_s19, %s262_s24  }
  0x6a PF: > { %s287_s6 = sand.u32 1, %s581_s9   ;;  %p816_p12 = scmp.ne.s32.totalorder %s810_s22, 0 }
  0x6b   : > { %p817_p2 = scmp.ge.s32.totalorder %s601_s14, 2  ;;  %s288_s17 = scalar_lea.sflag [#allocation4], %s287_s6 }
  0x6d   : > { %p414_p1 = pnand %p817_p2, %p816_p12 }
  0x6f   : > { %p415_p9 = pneg %p414_p1 }
  0x71   : > { %576 = dma.done.wait (%p415_p9), %s288_s17, 128  }
  0x72   : > { %578 = vsyncadd (%p415_p9), %s288_s17, 4294967168  ;;  %s19_s14 = sadd.s32 1, %s601_s14   ;;  %s818_s9 = smov %s585_s10 }
  0x73   : > { %p16_p8 = scmp.ge.s32.totalorder %s19_s14, 4   ;;  %s819_s10 = smov %s589_s11 }
  0x74   : > { %s820_s11 = smov %s732_s28  ;;  %s821_s12 = smov %s597_s13 }
  0x75   : > { %s822_s13 = smov %s824_s29  ;;  %18 = sbr.rel (!%p16_p8) target bundleno = 7 (0x7), region = 87 }
  0x7a   :  { %293 = vsyncpa [#allocation3], 1 }
  0x7b   :  { %295 = vsyncpa [#allocation3 + $0x1], 1 }
  0x7c   :  { %296 = vsyncpa [#allocation4], 1 }
  0x7d   :  { %298 = vsyncpa [#allocation4 + $0x1], 1 }
  0x7e   :  { %299 = vsyncpa [#allocation5], 1 }
  0x7f   :  { %301 = vsyncpa [#allocation5 + $0x1], 1 }

</bundles_post_ra>
